<compile_context>
chip_gen: v6e
topology: v6e:2x2x1
jax: 0.10.0
libtpu: 0.0.40
codegen_flags: <defaults>
</compile_context>

<pallas_src>
import functools

import jax
import jax.numpy as jnp
from jax.experimental import pallas as pl
from jax.experimental.pallas import tpu as pltpu

_LANES = 128
_TM_MAX = 512     # row-tile (sublane axis) -- fits v5e/v6e/v7x VMEM comfortably
_TK_MAX = 512     # contraction tile (lane axis)
_TR_MAX = 512     # reduction row tile


def _round_up(x, m):
    return -(-x // m) * m


# ----------------------------------------------------------------------------
# Pallas kernel bodies
# ----------------------------------------------------------------------------

def _matmul_bias_act_kernel(a_ref, w_ref, b_ref, o_ref, acc_ref, *, slope):
    """Tiled act(a @ w + b).  grid = (M tiles, K tiles); K is the reduction axis."""
    k = pl.program_id(1)

    @pl.when(k == 0)
    def _():
        acc_ref[...] = jnp.zeros_like(acc_ref)

    acc_ref[...] += jnp.dot(a_ref[...], w_ref[...],
                            preferred_element_type=jnp.float32)

    @pl.when(k == pl.num_programs(1) - 1)
    def _():
        z = acc_ref[...] + b_ref[...]
        if slope is not None:                     # leaky-relu (slope=0.0 -> relu)
            z = jnp.where(z >= 0, z, slope * z)
        o_ref[...] = z.astype(o_ref.dtype)


def _matmul_colreduce_kernel(a_ref, w_ref, b_ref, o_ref, acc_ref, *,
                             transform, n_valid_rows, tm):
    """Fused discriminator head: sum over valid rows of transform(a @ w + b)."""
    i = pl.program_id(0)
    k = pl.program_id(1)

    @pl.when(jnp.logical_and(i == 0, k == 0))
    def _():
        o_ref[...] = jnp.zeros_like(o_ref)

    @pl.when(k == 0)
    def _():
        acc_ref[...] = jnp.zeros_like(acc_ref)

    acc_ref[...] += jnp.dot(a_ref[...], w_ref[...],
                            preferred_element_type=jnp.float32)

    @pl.when(k == pl.num_programs(1) - 1)
    def _():
        z = acc_ref[...] + b_ref[...]                                 # (TM, 1)
        v = transform(z)
        rows = i * tm + jax.lax.broadcasted_iota(jnp.int32, (tm, 1), 0)
        v = jnp.where(rows < n_valid_rows, v, 0.0)
        o_ref[...] += jnp.sum(v, keepdims=True)


def _reduce_sum_kernel(*refs, partial_fn):
    """Generic tiled scalar reduction; accumulates into a resident (1,1) output."""
    *in_refs, o_ref = refs

    @pl.when(pl.program_id(0) == 0)
    def _():
        o_ref[...] = jnp.zeros_like(o_ref)

    o_ref[...] += partial_fn(*[r[...] for r in in_refs])


def _lpips_kernel(fx_ref, fy_ref, w_ref, o_ref):
    """LPIPS-style distance in lane-dense (N, C, P) layout (P on lanes)."""
    @pl.when(pl.program_id(0) == 0)
    def _():
        o_ref[...] = jnp.zeros_like(o_ref)

    fx = fx_ref[...].astype(jnp.float32)
    fy = fy_ref[...].astype(jnp.float32)
    nx = fx * jax.lax.rsqrt(jnp.sum(fx * fx, axis=1, keepdims=True) + 1e-10)
    ny = fy * jax.lax.rsqrt(jnp.sum(fy * fy, axis=1, keepdims=True) + 1e-10)
    d = (nx - ny) * (nx - ny) * w_ref[...]
    o_ref[...] += jnp.sum(d, keepdims=True)


# ----------------------------------------------------------------------------
# Tiled matmul wrapper (+ custom VJP so grads flow through Pallas kernels)
# ----------------------------------------------------------------------------

def _matmul_call(a, w, b, slope, out_dtype=jnp.float32):
    """act(a @ w + b) via tiled Pallas kernel.  a:(M,K), w:(K,N), b:(N,)."""
    M, K = a.shape
    _, N = w.shape
    a = a.astype(jnp.bfloat16)
    w = w.astype(jnp.bfloat16)
    b2 = jnp.reshape(b, (1, N)).astype(jnp.float32)

    kp0 = _round_up(K, _LANES)
    tk = min(_TK_MAX, kp0)
    kp = _round_up(kp0, tk)
    tm = min(_TM_MAX, _round_up(M, 8))
    mp = _round_up(M, tm)
    if (mp, kp) != (M, K):
        a = jnp.pad(a, ((0, mp - M), (0, kp - K)))
    if kp != K:
        w = jnp.pad(w, ((0, kp - K), (0, 0)))

    cost = pl.CostEstimate(
        flops=2 * mp * kp * N, transcendentals=0,
        bytes_accessed=mp * kp * 2 + kp * N * 2 + mp * N * 4 + N * 4)

    out = pl.pallas_call(
        functools.partial(_matmul_bias_act_kernel, slope=slope),
        grid=(mp // tm, kp // tk),
        in_specs=[pl.BlockSpec((tm, tk), lambda i, k: (i, k)),
                  pl.BlockSpec((tk, N), lambda i, k: (k, 0)),
                  pl.BlockSpec((1, N), lambda i, k: (0, 0))],
        out_specs=pl.BlockSpec((tm, N), lambda i, k: (i, 0)),
        out_shape=jax.ShapeDtypeStruct((mp, N), out_dtype),
        scratch_shapes=[pltpu.VMEM((tm, N), jnp.float32)],
        compiler_params=pltpu.CompilerParams(
            dimension_semantics=("parallel", "arbitrary")),
        cost_estimate=cost,
    )(a, w, b2)
    return out[:M] if mp != M else out


@functools.partial(jax.custom_vjp, nondiff_argnums=(3,))
def matmul_bias_act(a, w, b, slope):
    return _matmul_call(a, w, b, slope)


def _matmul_fwd(a, w, b, slope):
    y = _matmul_call(a, w, b, slope)
    return y, (a, w, b, y)


def _matmul_bwd(slope, res, dy):
    a, w, b, y = res
    dy = dy.astype(jnp.float32)
    dz = dy if slope is None else jnp.where(y > 0, dy, slope * dy)
    K = a.shape[1]
    zero_bias = jnp.zeros((K,), jnp.float32)
    # dA = dZ @ W^T        (Pallas, contraction over N)
    da = _matmul_call(dz, jnp.transpose(w), zero_bias, None)
    # dW = (dZ^T @ A)^T    (Pallas, contraction over M, tiled by the K grid axis)
    dwt = _matmul_call(jnp.transpose(dz), a, zero_bias, None)
    dw = jnp.transpose(dwt)
    db = jnp.sum(dz, axis=0)
    return (da.astype(a.dtype), dw.astype(w.dtype), db.astype(b.dtype))


matmul_bias_act.defvjp(_matmul_fwd, _matmul_bwd)


# ----------------------------------------------------------------------------
# Convolution via im2col (glue) + Pallas matmul (hot path)
# ----------------------------------------------------------------------------

def im2col(x, kh, kw, stride, pad):
    """x: NHWC -> (N*Ho*Wo, kh*kw*C) patches, plus (N, Ho, Wo)."""
    # TODO(synk): the kh*kw tap expansion is materialized in HBM; an in-kernel
    # streamed tap reduction (manual DMA) would cut this traffic further.
    xp = jnp.pad(x, ((0, 0), (pad, pad), (pad, pad), (0, 0)))
    N, H, W, C = xp.shape
    Ho = (H - kh) // stride + 1
    Wo = (W - kw) // stride + 1
    cols = []
    for i in range(kh):
        for j in range(kw):
            cols.append(xp[:, i:i + stride * Ho:stride, j:j + stride * Wo:stride, :])
    patches = jnp.concatenate(cols, axis=-1)
    return patches.reshape(N * Ho * Wo, kh * kw * C), (N, Ho, Wo)


def conv2d_pallas(x, w, b, stride, pad, slope=None):
    """x: NHWC, w: (kh, kw, Cin, Cout), b: (Cout,).  Differentiable (custom VJP)."""
    kh, kw, cin, cout = w.shape
    patches, (n, ho, wo) = im2col(x.astype(jnp.bfloat16), kh, kw, stride, pad)
    w2d = w.reshape(kh * kw * cin, cout).astype(jnp.bfloat16)
    out = matmul_bias_act(patches, w2d, b, slope)
    return out.reshape(n, ho, wo, cout)


# ----------------------------------------------------------------------------
# Tiled scalar reductions
# ----------------------------------------------------------------------------

def _reduce_sum(partial_fn, arrays, pad_values):
    """Sum partial_fn over all elements, tiled as (rows, 128) blocks."""
    L = int(arrays[0].size)
    rows = max(1, -(-L // _LANES))
    tr = min(_TR_MAX, _round_up(rows, 8))
    rows_p = _round_up(rows, tr)
    total = rows_p * _LANES
    flats = []
    for arr, pv in zip(arrays, pad_values):
        f = jnp.ravel(arr).astype(jnp.float32)
        f = jnp.pad(f, (0, total - L), constant_values=pv)
        flats.append(f.reshape(rows_p, _LANES))
    out = pl.pallas_call(
        functools.partial(_reduce_sum_kernel, partial_fn=partial_fn),
        grid=(rows_p // tr,),
        in_specs=[pl.BlockSpec((tr, _LANES), lambda i: (i, 0)) for _ in flats],
        out_specs=pl.BlockSpec((1, 1), lambda i: (0, 0)),
        out_shape=jax.ShapeDtypeStruct((1, 1), jnp.float32),
        compiler_params=pltpu.CompilerParams(dimension_semantics=("arbitrary",)),
    )(*flats)
    return out[0, 0]


def pallas_l1_mean(x, y):
    s = _reduce_sum(lambda a, b: jnp.sum(jnp.abs(a - b), keepdims=True),
                    [x, y], [0.0, 0.0])
    return s / x.size


def pallas_mean(x):
    return _reduce_sum(lambda a: jnp.sum(a, keepdims=True), [x], [0.0]) / x.size


def pallas_sumsq(x):
    return _reduce_sum(lambda a: jnp.sum(a * a, keepdims=True), [x], [0.0])


# ----------------------------------------------------------------------------
# Fused discriminator head (Cout=1 conv + scalar reduction)
# ----------------------------------------------------------------------------

def pallas_disc_head_sum(patches, w, b, transform):
    """sum_rows transform((patches @ w + b)) with row masking.  w:(K,1), b:(1,)."""
    M, K = patches.shape
    a = patches.astype(jnp.bfloat16)
    wcol = jnp.reshape(w, (K, 1)).astype(jnp.bfloat16)
    b2 = jnp.reshape(b, (1, 1)).astype(jnp.float32)
    kp0 = _round_up(K, _LANES)
    tk = min(_TK_MAX, kp0)
    kp = _round_up(kp0, tk)
    tm = min(_TM_MAX, _round_up(M, 8))
    mp = _round_up(M, tm)
    if (mp, kp) != (M, K):
        a = jnp.pad(a, ((0, mp - M), (0, kp - K)))
    if kp != K:
        wcol = jnp.pad(wcol, ((0, kp - K), (0, 0)))
    out = pl.pallas_call(
        functools.partial(_matmul_colreduce_kernel, transform=transform,
                          n_valid_rows=M, tm=tm),
        grid=(mp // tm, kp // tk),
        in_specs=[pl.BlockSpec((tm, tk), lambda i, k: (i, k)),
                  pl.BlockSpec((tk, 1), lambda i, k: (k, 0)),
                  pl.BlockSpec((1, 1), lambda i, k: (0, 0))],
        out_specs=pl.BlockSpec((1, 1), lambda i, k: (0, 0)),
        out_shape=jax.ShapeDtypeStruct((1, 1), jnp.float32),
        scratch_shapes=[pltpu.VMEM((tm, 1), jnp.float32)],
        compiler_params=pltpu.CompilerParams(
            dimension_semantics=("arbitrary", "arbitrary")),
    )(a, wcol, b2)
    return out[0, 0]


# ----------------------------------------------------------------------------
# LPIPS-style distance (lane-dense layout, tiled over spatial positions)
# ----------------------------------------------------------------------------

def pallas_lpips_mean(fx, fy, lin_w):
    """mean over (batch, spatial) of sum_c w_c * (norm(fx) - norm(fy))^2."""
    n, ho, wo, c = fx.shape
    p = ho * wo
    fxt = jnp.transpose(fx.reshape(n, p, c), (0, 2, 1)).astype(jnp.float32)
    fyt = jnp.transpose(fy.reshape(n, p, c), (0, 2, 1)).astype(jnp.float32)
    tp = min(512, _round_up(p, _LANES))
    pp = _round_up(p, tp)
    if pp != p:
        fxt = jnp.pad(fxt, ((0, 0), (0, 0), (0, pp - p)))
        fyt = jnp.pad(fyt, ((0, 0), (0, 0), (0, pp - p)))
    w3 = jnp.reshape(lin_w, (1, c, 1)).astype(jnp.float32)
    out = pl.pallas_call(
        _lpips_kernel,
        grid=(pp // tp,),
        in_specs=[pl.BlockSpec((n, c, tp), lambda i: (0, 0, i)),
                  pl.BlockSpec((n, c, tp), lambda i: (0, 0, i)),
                  pl.BlockSpec((1, c, 1), lambda i: (0, 0, 0))],
        out_specs=pl.BlockSpec((1, 1, 1), lambda i: (0, 0, 0)),
        out_shape=jax.ShapeDtypeStruct((1, 1, 1), jnp.float32),
        compiler_params=pltpu.CompilerParams(dimension_semantics=("arbitrary",)),
    )(fxt, fyt, w3)
    return out[0, 0, 0] / (n * p)


def lpips_mean_jnp(fx, fy, lin_w):
    """Differentiable (jnp) epilogue used only inside the adaptive-weight grads."""
    nx = fx * jax.lax.rsqrt(jnp.sum(fx * fx, axis=-1, keepdims=True) + 1e-10)
    ny = fy * jax.lax.rsqrt(jnp.sum(fy * fy, axis=-1, keepdims=True) + 1e-10)
    d = (nx - ny) ** 2 * jnp.reshape(lin_w, (1, 1, 1, -1))
    return jnp.mean(jnp.sum(d, axis=-1))


# ----------------------------------------------------------------------------
# Loss module
# ----------------------------------------------------------------------------

def adopt_weight(weight, global_step, threshold=0, value=0.0):
    # jit-safe (works with traced global_step)
    return jnp.where(jnp.asarray(global_step) < threshold, value, weight)


class VQLPIPSWithDiscriminatorPallas:
    """Pallas/TPU re-implementation of VQLPIPSWithDiscriminator.forward."""

    def __init__(self, disc_start, key, codebook_weight=1.0, pixelloss_weight=1.0,
                 disc_factor=1.0, disc_weight=1.0, perceptual_weight=1.0):
        self.codebook_weight = codebook_weight
        self.pixel_weight = pixelloss_weight
        self.perceptual_weight = perceptual_weight
        self.discriminator_iter_start = disc_start
        self.disc_factor = disc_factor
        self.discriminator_weight = disc_weight

        ks = jax.random.split(key, 8)
        std = 0.02  # weights_init: Normal(0.0, 0.02)

        # Synthetic PatchGAN-style discriminator (3 convs, LeakyReLU(0.2)).
        # TODO(synk): BatchNorm layers of the original Discriminator are omitted.
        self.d_w1 = jax.random.normal(ks[0], (4, 4, 3, 16), jnp.float32) * std
        self.d_b1 = jnp.zeros((16,), jnp.float32)
        self.d_w2 = jax.random.normal(ks[1], (4, 4, 16, 32), jnp.float32) * std
        self.d_b2 = jnp.zeros((32,), jnp.float32)
        self.d_w3 = jax.random.normal(ks[2], (4, 4, 32, 1), jnp.float32) * std
        self.d_b3 = jnp.zeros((1,), jnp.float32)

        # Simplified single-scale LPIPS feature net (3x3 conv + relu + per-channel lin).
        # TODO(synk): pretrained VGG-based LPIPSWithObject cannot be reproduced in-script.
        self.p_w = jax.random.normal(ks[3], (3, 3, 3, 16), jnp.float32) * 0.1
        self.p_b = jnp.zeros((16,), jnp.float32)
        self.p_lin = jnp.abs(jax.random.normal(ks[4], (16,), jnp.float32)) * 0.1

    # --- discriminator --------------------------------------------------------
    def _disc_trunk(self, x_nhwc):
        h = conv2d_pallas(x_nhwc, self.d_w1, self.d_b1, 2, 1, slope=0.2)
        h = conv2d_pallas(h, self.d_w2, self.d_b2, 2, 1, slope=0.2)
        return h

    def _discriminator_logits(self, x_nhwc):
        """Full logits path (differentiable, used under the adaptive-weight grads)."""
        h = self._disc_trunk(x_nhwc)
        return conv2d_pallas(h, self.d_w3, self.d_b3, 1, 1, slope=None)

    def _disc_head_reduce(self, x_nhwc, transform):
        """Fused last (Cout=1) conv + scalar reduction of transform(logits)."""
        h = self._disc_trunk(x_nhwc)
        kh, kw, cin, cout = self.d_w3.shape
        patches, (n, ho, wo) = im2col(h.astype(jnp.bfloat16), kh, kw, 1, 1)
        s = pallas_disc_head_sum(patches, self.d_w3.reshape(kh * kw * cin, cout),
                                 self.d_b3, transform)
        return s, n * ho * wo

    # --- perceptual (LPIPS-like) ---------------------------------------------
    def _p_features(self, img_nhwc):
        return conv2d_pallas(img_nhwc, self.p_w, self.p_b, 1, 1, slope=0.0)

    # --- adaptive generator/discriminator weight ------------------------------
    def calculate_adaptive_weight(self, x_nhwc, fx, h_feat, w_last, b_last):
        nb, hh, ww, ch = h_feat.shape
        h2d = h_feat.reshape(nb * hh * ww, ch)

        # TODO(synk): the original differentiates through the real VQ decoder's
        # last layer; here a synthetic 1x1-conv last layer stands in.  Gradients
        # flow through the Pallas conv kernels via their custom VJP; the tiny
        # scalar reduction epilogues use jnp for differentiability.
        def losses(W):
            rec = matmul_bias_act(h2d, W, b_last, None).reshape(nb, hh, ww, -1)
            l1 = jnp.mean(jnp.abs(x_nhwc - rec))
            fr = self._p_features(rec)
            p = lpips_mean_jnp(fx, fr, self.p_lin)
            nll = l1 + self.perceptual_weight * p
            g = -jnp.mean(self._discriminator_logits(rec))
            return nll, g

        # One shared forward, two backward pullbacks (like retain_graph=True).
        (nll_v, g_v), pullback = jax.vjp(losses, w_last)
        nll_grads, = pullback((jnp.ones_like(nll_v), jnp.zeros_like(g_v)))
        g_grads, = pullback((jnp.zeros_like(nll_v), jnp.ones_like(g_v)))

        nll_norm = jnp.sqrt(pallas_sumsq(nll_grads))
        g_norm = jnp.sqrt(pallas_sumsq(g_grads))
        d_weight = jnp.clip(nll_norm / (g_norm + 1e-4), 0.0, 1e4)
        return jax.lax.stop_gradient(d_weight) * self.discriminator_weight

    # --- forward ---------------------------------------------------------------
    def forward(self, optimizer_idx, global_step, images, reconstructions,
                codebook_loss=None, bbox_obj=None, bbox_face=None, last_layer=None):
        # inputs are NCHW (PyTorch convention); transpose to kernel NHWC layout
        x = jnp.transpose(jnp.asarray(images, jnp.float32), (0, 2, 3, 1))
        y = jnp.transpose(jnp.asarray(reconstructions, jnp.float32), (0, 2, 3, 1))
        disc_factor = adopt_weight(self.disc_factor, global_step,
                                   threshold=self.discriminator_iter_start)

        if optimizer_idx == 0:
            # nll = mean(|x-y| + pw*p_loss) = mean|x-y| + pw*mean(p_loss)
            l1_mean = pallas_l1_mean(x, y)
            # TODO(synk): bbox_obj-weighted perceptual term of LPIPSWithObject not modeled.
            fx = self._p_features(x)
            fy = self._p_features(y)
            p_loss = pallas_lpips_mean(fx, fy, self.p_lin)
            nll_loss = l1_mean + self.perceptual_weight * p_loss

            if bbox_face is None:
                bbox_face = (4, 12, 4, 12)
            bt, bb, bl, br = bbox_face
            # TODO(synk): original FaceLoss uses a pretrained face network; modeled
            # as an L1 loss over the face bounding-box crop.
            face_loss = pallas_l1_mean(x[:, bt:bb, bl:br, :], y[:, bt:bb, bl:br, :])
            object_loss = jnp.float32(0.0)                         # images.new_tensor(0)

            g_sum, g_cnt = self._disc_head_reduce(y, lambda z: z)
            g_loss = -(g_sum / g_cnt)

            h_feat, w_last, b_last = last_layer
            d_weight = self.calculate_adaptive_weight(x, fx, h_feat, w_last, b_last)

            loss = (nll_loss
                    + d_weight * disc_factor * g_loss
                    + self.codebook_weight * pallas_mean(codebook_loss)
                    + face_loss + object_loss)
            return loss, (nll_loss, object_loss, face_loss)

        if optimizer_idx == 1:
            sr, cnt = self._disc_head_reduce(x, lambda z: jnp.maximum(1.0 - z, 0.0))
            sf, _ = self._disc_head_reduce(y, lambda z: jnp.maximum(1.0 + z, 0.0))
            d_loss = disc_factor * 0.5 * (sr / cnt + sf / cnt)
            return d_loss


# ----------------------------------------------------------------------------
# Demo
# ----------------------------------------------------------------------------

if __name__ == "__main__":
    key = jax.random.PRNGKey(0)
    k_img, k_h, k_w, k_cb, k_mod = jax.random.split(key, 5)

    N, C, H, W = 2, 3, 16, 16
    HIDDEN = 32

    # images in NCHW, like the PyTorch module expects
    images = jax.random.normal(k_img, (N, C, H, W), jnp.float32)

    # synthetic decoder "last layer": 1x1 conv (HIDDEN -> C) producing reconstructions.
    h_feat = jax.random.normal(k_h, (N, H, W, HIDDEN), jnp.float32) * 0.1
    w_last = jax.random.normal(k_w, (HIDDEN, C), jnp.float32) * 0.02
    b_last = jnp.zeros((C,), jnp.float32)
    rec_nhwc = matmul_bias_act(
        h_feat.reshape(N * H * W, HIDDEN), w_last, b_last, None).reshape(N, H, W, C)
    reconstructions = jnp.transpose(rec_nhwc, (0, 3, 1, 2))            # back to NCHW

    codebook_loss = jax.random.uniform(k_cb, (N,), jnp.float32)

    module = VQLPIPSWithDiscriminatorPallas(disc_start=0, key=k_mod)

    @jax.jit
    def gen_step(imgs, recs, cb, hf, wl, bl):
        return module.forward(0, 10, imgs, recs, cb, bbox_obj=None,
                              bbox_face=(4, 12, 4, 12), last_layer=(hf, wl, bl))

    @jax.jit
    def disc_step(imgs, recs, cb):
        return module.forward(1, 10, imgs, recs, cb)

    loss, (nll_loss, object_loss, face_loss) = gen_step(
        images, reconstructions, codebook_loss, h_feat, w_last, b_last)
    d_loss = disc_step(images, reconstructions, codebook_loss)

    jax.block_until_ready((loss, nll_loss, object_loss, face_loss, d_loss))
    print("KERNEL_OK")
</pallas_src>

<mosaic_0001>
module attributes {stable_mosaic.version = 11 : i64} {
  func.func @_matmul_bias_act_kernel(%arg0: i32, %arg1: i32, %arg2: memref<512x128xbf16, #tpu.memory_space<vmem>>, %arg3: memref<128x3xbf16, #tpu.memory_space<vmem>>, %arg4: memref<1x3xf32, #tpu.memory_space<vmem>>, %arg5: memref<512x3xf32, #tpu.memory_space<vmem>>, %arg6: memref<512x3xf32, #tpu.memory_space<vmem>>) attributes {dimension_semantics = [#tpu.dimension_semantics<parallel>, #tpu.dimension_semantics<arbitrary>], iteration_bounds = array<i64: 1, 1>, scalar_prefetch = 0 : i64, scratch_operands = 1 : i64, tpu.core_type = #tpu.core_type<tc>, window_params = [{transform_indices = @transform_0, window_bounds = array<i64: 512, 128>}, {transform_indices = @transform_1, window_bounds = array<i64: 128, 3>}, {pipeline_mode = #tpu.pipeline_mode<synchronous>, transform_indices = @transform_2, window_bounds = array<i64: 1, 3>}, {transform_indices = @transform_3, window_bounds = array<i64: 512, 3>}]} {
    %c0_i32 = arith.constant 0 : i32
    %0 = arith.cmpi eq, %arg1, %c0_i32 : i32
    %1 = arith.extui %0 : i1 to i32
    %c0_i32_0 = arith.constant 0 : i32
    %2 = arith.cmpi ne, %1, %c0_i32_0 : i32
    scf.if %2 {
      %cst_10 = arith.constant 0.000000e+00 : f32
      %12 = vector.broadcast %cst_10 : f32 to vector<512x3xf32>
      %c0_11 = arith.constant 0 : index
      %c0_12 = arith.constant 0 : index
      %13 = vector.load %arg6[%c0_11, %c0_12] : memref<512x3xf32, #tpu.memory_space<vmem>>, vector<512x3xf32>
      tpu.vector_store %arg6[%c0_11, %c0_12], %12 {strides = array<i32>} : memref<512x3xf32, #tpu.memory_space<vmem>>, vector<512x3xf32>,
    } else {
    }
    %c0 = arith.constant 0 : index
    %c0_1 = arith.constant 0 : index
    %3 = vector.load %arg6[%c0, %c0_1] : memref<512x3xf32, #tpu.memory_space<vmem>>, vector<512x3xf32>
    %c0_2 = arith.constant 0 : index
    %c0_3 = arith.constant 0 : index
    %4 = vector.load %arg2[%c0_2, %c0_3] : memref<512x128xbf16, #tpu.memory_space<vmem>>, vector<512x128xbf16>
    %c0_4 = arith.constant 0 : index
    %c0_5 = arith.constant 0 : index
    %5 = vector.load %arg3[%c0_4, %c0_5] : memref<128x3xbf16, #tpu.memory_space<vmem>>, vector<128x3xbf16>
    %cst = arith.constant dense<0.000000e+00> : vector<512x3xf32>
    %6 = tpu.matmul %4, %5, %cst {dimension_numbers = #tpu.dot_dimension_numbers<[1], [0], [0], [1], [0, 0, 1, 1], [], []>} : vector<512x128xbf16>, vector<128x3xbf16>, vector<512x3xf32> -> vector<512x3xf32>
    %7 = arith.addf %3, %6 : vector<512x3xf32>
    %c0_6 = arith.constant 0 : index
    %c0_7 = arith.constant 0 : index
    %8 = vector.load %arg6[%c0_6, %c0_7] : memref<512x3xf32, #tpu.memory_space<vmem>>, vector<512x3xf32>
    tpu.vector_store %arg6[%c0_6, %c0_7], %7 {strides = array<i32>} : memref<512x3xf32, #tpu.memory_space<vmem>>, vector<512x3xf32>,
    %c0_i32_8 = arith.constant 0 : i32
    %9 = arith.cmpi eq, %arg1, %c0_i32_8 : i32
    %10 = arith.extui %9 : i1 to i32
    %c0_i32_9 = arith.constant 0 : i32
    %11 = arith.cmpi ne, %10, %c0_i32_9 : i32
    scf.if %11 {
      %c0_10 = arith.constant 0 : index
      %c0_11 = arith.constant 0 : index
      %12 = vector.load %arg6[%c0_10, %c0_11] : memref<512x3xf32, #tpu.memory_space<vmem>>, vector<512x3xf32>
      %c0_12 = arith.constant 0 : index
      %c0_13 = arith.constant 0 : index
      %13 = vector.load %arg4[%c0_12, %c0_13] : memref<1x3xf32, #tpu.memory_space<vmem>>, vector<1x3xf32>
      %14 = vector.broadcast %13 : vector<1x3xf32> to vector<512x3xf32>
      %15 = arith.addf %12, %14 : vector<512x3xf32>
      %c0_14 = arith.constant 0 : index
      %c0_15 = arith.constant 0 : index
      %16 = vector.load %arg5[%c0_14, %c0_15] : memref<512x3xf32, #tpu.memory_space<vmem>>, vector<512x3xf32>
      tpu.vector_store %arg5[%c0_14, %c0_15], %15 {strides = array<i32>} : memref<512x3xf32, #tpu.memory_space<vmem>>, vector<512x3xf32>,
    } else {
    }
    return
  }
  func.func @transform_0(%arg0: i32, %arg1: i32) -> (i32, i32) {
    %c0_i32 = arith.constant 0 : i32
    return %arg0, %arg1 : i32, i32
  }
  func.func @transform_1(%arg0: i32, %arg1: i32) -> (i32, i32) {
    %c0_i32 = arith.constant 0 : i32
    %c0_i32_0 = arith.constant 0 : i32
    return %arg1, %c0_i32 : i32, i32
  }
  func.func @transform_2(%arg0: i32, %arg1: i32) -> (i32, i32) {
    %c0_i32 = arith.constant 0 : i32
    %c0_i32_0 = arith.constant 0 : i32
    %c0_i32_1 = arith.constant 0 : i32
    return %c0_i32, %c0_i32_0 : i32, i32
  }
  func.func @transform_3(%arg0: i32, %arg1: i32) -> (i32, i32) {
    %c0_i32 = arith.constant 0 : i32
    %c0_i32_0 = arith.constant 0 : i32
    return %arg0, %c0_i32 : i32, i32
  }
}

</mosaic_0001>

<bundles_post_ra>
// kernel: tpu_custom_call.1
= control target key start
LH: loop header
LB: loop body
LE: loop exit
PB: predicated region body
PF: predicated region fallthrough
CT: control target
= control target key end

     0   :  { %8 = vsyncpa [#allocation4], 0  ;;  %s1350_s12 = smov [#allocation3]   ;;  %s1918_s0 = inlined_call_operand.hbm [shape: bf16[512,128], index: 0, kind: input, shape index: {}]   ;;  %s1919_s1 = inlined_call_operand.vmem [shape: bf16[128,3], index: 1, kind: input, shape index: {}]   ;;  %s1920_s2 = inlined_call_operand.vmem [shape: f32[1,3], index: 2, kind: input, shape index: {}]   ;;  %s1921_s3 = inlined_call_operand.vmem [shape: f32[512,3], index: 3, kind: output, shape index: {}]  }
   0x1   :  { %s14_s13 = sshll.u32 %s1350_s12, 4  ;;  %s15_s13 = int_to_ptr.vmem [resolvable:$true] %s14_s13 }
   0x2   :  { %s1336_s14 = scalar_lea.vmem %s15_s13, 4096  ;;  %p1341_p1 = scmp.lt.s32.totalorder %s15_s13, %s15_s13 }
   0x3   :  { %p1337_p0 = scmp.ne.s32.totalorder %s15_s13, %s1336_s14  ;;  %p1342_p2 = scmp.lt.s32.totalorder %s1336_s14, %s1336_s14 }
   0x5   :  { %p1343_p3 = por %p1342_p2, %p1341_p1 }
   0x7   :  { %p1344_p4 = pnand %p1343_p3, %p1337_p0 }
   0x9   :  { %1347 = shalt.err (!%p1344_p4)
}
   0xa   :  { %s1351_s15 = smov 64   ;;  %s1352_s16 = smov 4  }
   0xb   :  { %20 = dma.hbm_to_vmem [thread:$0]  %s1918_s0, 4096, %s15_s13, [#allocation4], %s1351_s15, %s1351_s15, %s1352_s16  }
   0xc   :  { %1348 = dma.done.wait [#allocation4], 4096  }
   0xd   :  { %1349 = vsyncadd [#allocation4], 4294963200  ;;  %vm33_vm0 = vcmask 23552   ;;  %v1353_v0 = vmov 0.0   ;;  %v1288_v1 = vld [vmem:[%s1919_s1 + $0x38] sm:$0xff]   ;;  %v1289_v2 = vld [vmem:[%s1919_s1 + $0x30] sm:$0xff]  }
   0xe   :  { %36 = vst.msk [vmem:[#allocation2 + $0x10] sm:$0xff] %vm33_vm0, %v1353_v0  ;;  %34 = vst.msk [vmem:[#allocation2] sm:$0xff] %vm33_vm0, %v1353_v0  ;;  %1188 = vmatprep.subr.bf16.mxu0 %v1288_v1  ;;  %1268 = vmatprep.subr.bf16.mxu1 %v1288_v1  ;;  %v1290_v3 = vld [vmem:[%s1919_s1 + $0x28] sm:$0xff]   ;;  %v1291_v4 = vld [vmem:[%s1919_s1 + $0x20] sm:$0xff]  }
   0xf   :  { %35 = vst.msk [vmem:[#allocation2 + $0x8] sm:$0xff] %vm33_vm0, %v1353_v0  ;;  %37 = vst.msk [vmem:[#allocation2 + $0x18] sm:$0xff] %vm33_vm0, %v1353_v0  ;;  %1189 = vmatpush3.bf16.msra.mxu0 %v1288_v1  ;;  %1276 = vmatpush3.bf16.msra.mxu1 %v1288_v1  ;;  %v1296_v5 = vld [vmem:[#allocation3] sm:$0xff]   ;;  %v1292_v7 = vld [vmem:[%s1919_s1 + $0x18] sm:$0xff]  }
  0x10   :  { %38 = vst.msk [vmem:[#allocation2 + $0x20] sm:$0xff] %vm33_vm0, %v1353_v0  ;;  %39 = vst.msk [vmem:[#allocation2 + $0x28] sm:$0xff] %vm33_vm0, %v1353_v0  ;;  %1190 = vmatprep.subr.bf16.mxu0 %v1289_v2  ;;  %1269 = vmatprep.subr.bf16.mxu1 %v1289_v2  ;;  %v1297_v6 = vld [vmem:[#allocation3 + $0x80] sm:$0xff]   ;;  %v1293_v8 = vld [vmem:[%s1919_s1 + $0x10] sm:$0xff]  }
  0x11   :  { %40 = vst.msk [vmem:[#allocation2 + $0x30] sm:$0xff] %vm33_vm0, %v1353_v0  ;;  %41 = vst.msk [vmem:[#allocation2 + $0x38] sm:$0xff] %vm33_vm0, %v1353_v0  ;;  %1204 = vmatprep.mubr.bf16.mxu0 %v1296_v5  ;;  %1236 = vmatprep.mubr.bf16.mxu1 %v1297_v6  ;;  %v1294_v9 = vld [vmem:[%s1919_s1 + $0x8] sm:$0xff]   ;;  %v1295_v10 = vld [vmem:[%s1919_s1] sm:$0xff]  }
  0x12   :  { %42 = vst.msk [vmem:[#allocation2 + $0x40] sm:$0xff] %vm33_vm0, %v1353_v0  ;;  %43 = vst.msk [vmem:[#allocation2 + $0x48] sm:$0xff] %vm33_vm0, %v1353_v0  ;;  %v1298_v11 = vld [vmem:[#allocation3 + $0x8] sm:$0xff]   ;;  %v1300_v13 = vld [vmem:[#allocation3 + $0x10] sm:$0xff]  }
  0x13   :  { %44 = vst.msk [vmem:[#allocation2 + $0x50] sm:$0xff] %vm33_vm0, %v1353_v0  ;;  %45 = vst.msk [vmem:[#allocation2 + $0x58] sm:$0xff] %vm33_vm0, %v1353_v0  ;;  %1191 = vmatpush3.bf16.msra.mxu0 %v1289_v2  ;;  %1277 = vmatpush3.bf16.msra.mxu1 %v1289_v2  ;;  %v1299_v12 = vld [vmem:[#allocation3 + $0x88] sm:$0xff]   ;;  %v1301_v14 = vld [vmem:[#allocation3 + $0x90] sm:$0xff]  }
  0x14   :  { %46 = vst.msk [vmem:[#allocation2 + $0x60] sm:$0xff] %vm33_vm0, %v1353_v0  ;;  %47 = vst.msk [vmem:[#allocation2 + $0x68] sm:$0xff] %vm33_vm0, %v1353_v0  ;;  %1192 = vmatprep.subr.bf16.mxu0 %v1290_v3  ;;  %1270 = vmatprep.subr.bf16.mxu1 %v1290_v3  ;;  %v1302_v15 = vld [vmem:[#allocation3 + $0x18] sm:$0xff]   ;;  %v1304_v17 = vld [vmem:[#allocation3 + $0x20] sm:$0xff]  }
  0x15   :  { %48 = vst.msk [vmem:[#allocation2 + $0x70] sm:$0xff] %vm33_vm0, %v1353_v0  ;;  %49 = vst.msk [vmem:[#allocation2 + $0x78] sm:$0xff] %vm33_vm0, %v1353_v0  ;;  %v1303_v16 = vld [vmem:[#allocation3 + $0x98] sm:$0xff]   ;;  %v1305_v18 = vld [vmem:[#allocation3 + $0xa0] sm:$0xff]  }
  0x16   :  { %50 = vst.msk [vmem:[#allocation2 + $0x80] sm:$0xff] %vm33_vm0, %v1353_v0  ;;  %51 = vst.msk [vmem:[#allocation2 + $0x88] sm:$0xff] %vm33_vm0, %v1353_v0  ;;  %v1306_v19 = vld [vmem:[#allocation3 + $0x28] sm:$0xff]   ;;  %v1308_v21 = vld [vmem:[#allocation3 + $0x30] sm:$0xff]  }
  0x17   :  { %52 = vst.msk [vmem:[#allocation2 + $0x90] sm:$0xff] %vm33_vm0, %v1353_v0  ;;  %53 = vst.msk [vmem:[#allocation2 + $0x98] sm:$0xff] %vm33_vm0, %v1353_v0  ;;  %1193 = vmatpush3.bf16.msra.mxu0 %v1290_v3  ;;  %1278 = vmatpush3.bf16.msra.mxu1 %v1290_v3  ;;  %v1307_v20 = vld [vmem:[#allocation3 + $0xa8] sm:$0xff]   ;;  %v1309_v22 = vld [vmem:[#allocation3 + $0xb0] sm:$0xff]  }
  0x18   :  { %54 = vst.msk [vmem:[#allocation2 + $0xa0] sm:$0xff] %vm33_vm0, %v1353_v0  ;;  %55 = vst.msk [vmem:[#allocation2 + $0xa8] sm:$0xff] %vm33_vm0, %v1353_v0  ;;  %1194 = vmatprep.subr.bf16.mxu0 %v1291_v4  ;;  %1271 = vmatprep.subr.bf16.mxu1 %v1291_v4  ;;  %v1310_v23 = vld [vmem:[#allocation3 + $0x38] sm:$0xff]   ;;  %v1312_v25 = vld [vmem:[#allocation3 + $0x40] sm:$0xff]  }
  0x19   :  { %56 = vst.msk [vmem:[#allocation2 + $0xb0] sm:$0xff] %vm33_vm0, %v1353_v0  ;;  %57 = vst.msk [vmem:[#allocation2 + $0xb8] sm:$0xff] %vm33_vm0, %v1353_v0  ;;  %v1311_v24 = vld [vmem:[#allocation3 + $0xb8] sm:$0xff]   ;;  %v1313_v26 = vld [vmem:[#allocation3 + $0xc0] sm:$0xff]  }
  0x1a   :  { %58 = vst.msk [vmem:[#allocation2 + $0xc0] sm:$0xff] %vm33_vm0, %v1353_v0  ;;  %59 = vst.msk [vmem:[#allocation2 + $0xc8] sm:$0xff] %vm33_vm0, %v1353_v0  ;;  %v1314_v27 = vld [vmem:[#allocation3 + $0x48] sm:$0xff]   ;;  %v1316_v29 = vld [vmem:[#allocation3 + $0x50] sm:$0xff]  }
  0x1b   :  { %60 = vst.msk [vmem:[#allocation2 + $0xd0] sm:$0xff] %vm33_vm0, %v1353_v0  ;;  %61 = vst.msk [vmem:[#allocation2 + $0xd8] sm:$0xff] %vm33_vm0, %v1353_v0  ;;  %1195 = vmatpush3.bf16.msra.mxu0 %v1291_v4  ;;  %1279 = vmatpush3.bf16.msra.mxu1 %v1291_v4  ;;  %v1315_v28 = vld [vmem:[#allocation3 + $0xc8] sm:$0xff]   ;;  %v1317_v30 = vld [vmem:[#allocation3 + $0xd0] sm:$0xff]  }
  0x1c   :  { %62 = vst.msk [vmem:[#allocation2 + $0xe0] sm:$0xff] %vm33_vm0, %v1353_v0  ;;  %63 = vst.msk [vmem:[#allocation2 + $0xe8] sm:$0xff] %vm33_vm0, %v1353_v0  ;;  %1196 = vmatprep.subr.bf16.mxu0 %v1292_v7  ;;  %1272 = vmatprep.subr.bf16.mxu1 %v1292_v7  ;;  %v1318_v31 = vld [vmem:[#allocation3 + $0x58] sm:$0xff]   ;;  %v1320_v33 = vld [vmem:[#allocation3 + $0x60] sm:$0xff]  }
  0x1d   :  { %64 = vst.msk [vmem:[#allocation2 + $0xf0] sm:$0xff] %vm33_vm0, %v1353_v0  ;;  %65 = vst.msk [vmem:[#allocation2 + $0xf8] sm:$0xff] %vm33_vm0, %v1353_v0  ;;  %v1319_v32 = vld [vmem:[#allocation3 + $0xd8] sm:$0xff]   ;;  %v1321_v34 = vld [vmem:[#allocation3 + $0xe0] sm:$0xff]  }
  0x1e   :  { %66 = vst.msk [vmem:[#allocation2 + $0x100] sm:$0xff] %vm33_vm0, %v1353_v0  ;;  %67 = vst.msk [vmem:[#allocation2 + $0x108] sm:$0xff] %vm33_vm0, %v1353_v0  ;;  %v1322_v35 = vld [vmem:[#allocation3 + $0x68] sm:$0xff]   ;;  %v1324_v37 = vld [vmem:[#allocation3 + $0x70] sm:$0xff]  }
  0x1f   :  { %68 = vst.msk [vmem:[#allocation2 + $0x110] sm:$0xff] %vm33_vm0, %v1353_v0  ;;  %69 = vst.msk [vmem:[#allocation2 + $0x118] sm:$0xff] %vm33_vm0, %v1353_v0  ;;  %1197 = vmatpush3.bf16.msra.mxu0 %v1292_v7  ;;  %1280 = vmatpush3.bf16.msra.mxu1 %v1292_v7  ;;  %v1323_v36 = vld [vmem:[#allocation3 + $0xe8] sm:$0xff]   ;;  %v1325_v38 = vld [vmem:[#allocation3 + $0xf0] sm:$0xff]  }
  0x20   :  { %70 = vst.msk [vmem:[#allocation2 + $0x120] sm:$0xff] %vm33_vm0, %v1353_v0  ;;  %71 = vst.msk [vmem:[#allocation2 + $0x128] sm:$0xff] %vm33_vm0, %v1353_v0  ;;  %1198 = vmatprep.subr.bf16.mxu0 %v1293_v8  ;;  %1273 = vmatprep.subr.bf16.mxu1 %v1293_v8  ;;  %v1326_v39 = vld [vmem:[#allocation3 + $0x78] sm:$0xff]   ;;  %v100_v41 = vld [vmem:[#allocation2 + $0x10] sm:$0xff] }
  0x21   :  { %72 = vst.msk [vmem:[#allocation2 + $0x130] sm:$0xff] %vm33_vm0, %v1353_v0  ;;  %73 = vst.msk [vmem:[#allocation2 + $0x138] sm:$0xff] %vm33_vm0, %v1353_v0  ;;  %v1327_v40 = vld [vmem:[#allocation3 + $0xf8] sm:$0xff]   ;;  %v98_v45 = vld [vmem:[#allocation2] sm:$0xff] }
  0x22   :  { %74 = vst.msk [vmem:[#allocation2 + $0x140] sm:$0xff] %vm33_vm0, %v1353_v0  ;;  %75 = vst.msk [vmem:[#allocation2 + $0x148] sm:$0xff] %vm33_vm0, %v1353_v0  ;;  %v101_v51 = vld [vmem:[#allocation2 + $0x18] sm:$0xff]  ;;  %v99_v57 = vld [vmem:[#allocation2 + $0x8] sm:$0xff] }
  0x23   :  { %76 = vst.msk [vmem:[#allocation2 + $0x150] sm:$0xff] %vm33_vm0, %v1353_v0  ;;  %77 = vst.msk [vmem:[#allocation2 + $0x158] sm:$0xff] %vm33_vm0, %v1353_v0  ;;  %1199 = vmatpush3.bf16.msra.mxu0 %v1293_v8  ;;  %1281 = vmatpush3.bf16.msra.mxu1 %v1293_v8  ;;  %v104_v63 = vld [vmem:[#allocation2 + $0x30] sm:$0xff]  ;;  %v1538_v3 = vld [vmem:[%s1920_s2] ss:$0 sm:$0xff] }
  0x24   :  { %78 = vst.msk [vmem:[#allocation2 + $0x160] sm:$0xff] %vm33_vm0, %v1353_v0  ;;  %79 = vst.msk [vmem:[#allocation2 + $0x168] sm:$0xff] %vm33_vm0, %v1353_v0  ;;  %1200 = vmatprep.subr.bf16.mxu0 %v1294_v9  ;;  %1274 = vmatprep.subr.bf16.mxu1 %v1294_v9  ;;  %v102_v6 = vld [vmem:[#allocation2 + $0x20] sm:$0xff] }
  0x25   :  { %80 = vst.msk [vmem:[#allocation2 + $0x170] sm:$0xff] %vm33_vm0, %v1353_v0  ;;  %81 = vst.msk [vmem:[#allocation2 + $0x178] sm:$0xff] %vm33_vm0, %v1353_v0  ;;  %v130_v46 = vld [vmem:[#allocation2 + $0x100] sm:$0xff]  ;;  %v131_v58 = vld [vmem:[#allocation2 + $0x108] sm:$0xff] }
  0x26   :  { %82 = vst.msk [vmem:[#allocation2 + $0x180] sm:$0xff] %vm33_vm0, %v1353_v0  ;;  %83 = vst.msk [vmem:[#allocation2 + $0x188] sm:$0xff] %vm33_vm0, %v1353_v0  ;;  %v132_v42 = vld [vmem:[#allocation2 + $0x110] sm:$0xff]  ;;  %v133_v52 = vld [vmem:[#allocation2 + $0x118] sm:$0xff] }
  0x27   :  { %84 = vst.msk [vmem:[#allocation2 + $0x190] sm:$0xff] %vm33_vm0, %v1353_v0  ;;  %85 = vst.msk [vmem:[#allocation2 + $0x198] sm:$0xff] %vm33_vm0, %v1353_v0  ;;  %1201 = vmatpush3.bf16.msra.mxu0 %v1294_v9  ;;  %1282 = vmatpush3.bf16.msra.mxu1 %v1294_v9  ;;  %v134_v7 = vld [vmem:[#allocation2 + $0x120] sm:$0xff] }
  0x28   :  { %86 = vst.msk [vmem:[#allocation2 + $0x1a0] sm:$0xff] %vm33_vm0, %v1353_v0  ;;  %87 = vst.msk [vmem:[#allocation2 + $0x1a8] sm:$0xff] %vm33_vm0, %v1353_v0  ;;  %1202 = vmatprep.subr.bf16.mxu0 %v1295_v10  ;;  %1275 = vmatprep.subr.bf16.mxu1 %v1295_v10 }
  0x29   :  { %88 = vst.msk [vmem:[#allocation2 + $0x1b0] sm:$0xff] %vm33_vm0, %v1353_v0  ;;  %89 = vst.msk [vmem:[#allocation2 + $0x1b8] sm:$0xff] %vm33_vm0, %v1353_v0 }
  0x2a   :  { %90 = vst.msk [vmem:[#allocation2 + $0x1c0] sm:$0xff] %vm33_vm0, %v1353_v0  ;;  %91 = vst.msk [vmem:[#allocation2 + $0x1c8] sm:$0xff] %vm33_vm0, %v1353_v0 }
  0x2b   :  { %92 = vst.msk [vmem:[#allocation2 + $0x1d0] sm:$0xff] %vm33_vm0, %v1353_v0  ;;  %93 = vst.msk [vmem:[#allocation2 + $0x1d8] sm:$0xff] %vm33_vm0, %v1353_v0  ;;  %1203 = vmatpush3.bf16.msra.mxu0 %v1295_v10  ;;  %1283 = vmatpush3.bf16.msra.mxu1 %v1295_v10  ;;  %v105_v10 = vld [vmem:[#allocation2 + $0x38] sm:$0xff] }
  0x2c   :  { %94 = vst.msk [vmem:[#allocation2 + $0x1e0] sm:$0xff] %vm33_vm0, %v1353_v0  ;;  %95 = vst.msk [vmem:[#allocation2 + $0x1e8] sm:$0xff] %vm33_vm0, %v1353_v0 }
  0x2d   :  { %96 = vst.msk [vmem:[#allocation2 + $0x1f0] sm:$0xff] %vm33_vm0, %v1353_v0  ;;  %97 = vst.msk [vmem:[#allocation2 + $0x1f8] sm:$0xff] %vm33_vm0, %v1353_v0  ;;  %v136_v0 = vld [vmem:[#allocation2 + $0x130] sm:$0xff] }
  0x2e   :  { %1205 = vmatmul.mubr.bf16.vlgmr.msra.gmra.mxu0 %v1298_v11  ;;  %1237 = vmatmul.mubr.bf16.vlgmr.msra.gmra.mxu1 %v1299_v12 }
  0x2f   :  { %1208 = vmatprep.mubr.bf16.mxu0 %v1300_v13  ;;  %1240 = vmatprep.mubr.bf16.mxu1 %v1301_v14 }
  0x36   :  { %1209 = vmatmul.mubr.bf16.gmra.mxu0 %v1302_v15  ;;  %1241 = vmatmul.mubr.bf16.gmra.mxu1 %v1303_v16  ;;  %v137_v15 = vld [vmem:[#allocation2 + $0x138] sm:$0xff] }
  0x37   :  { %1212 = vmatprep.mubr.bf16.mxu0 %v1304_v17  ;;  %1244 = vmatprep.mubr.bf16.mxu1 %v1305_v18 }
  0x3e   :  { %1213 = vmatmul.mubr.bf16.gmra.mxu0 %v1306_v19  ;;  %1245 = vmatmul.mubr.bf16.gmra.mxu1 %v1307_v20  ;;  %v103_v20 = vld [vmem:[#allocation2 + $0x28] sm:$0xff] }
  0x3f   :  { %1216 = vmatprep.mubr.bf16.mxu0 %v1308_v21  ;;  %1248 = vmatprep.mubr.bf16.mxu1 %v1309_v22 }
  0x46   :  { %1217 = vmatmul.mubr.bf16.gmra.mxu0 %v1310_v23  ;;  %1249 = vmatmul.mubr.bf16.gmra.mxu1 %v1311_v24 }
  0x47   :  { %1220 = vmatprep.mubr.bf16.mxu0 %v1312_v25  ;;  %1252 = vmatprep.mubr.bf16.mxu1 %v1313_v26  ;;  %v135_v25 = vld [vmem:[#allocation2 + $0x128] sm:$0xff] }
  0x4e   :  { %1221 = vmatmul.mubr.bf16.gmra.mxu0 %v1314_v27  ;;  %1253 = vmatmul.mubr.bf16.gmra.mxu1 %v1315_v28 }
  0x4f   :  { %1224 = vmatprep.mubr.bf16.mxu0 %v1316_v29  ;;  %1256 = vmatprep.mubr.bf16.mxu1 %v1317_v30  ;;  %v108_v30 = vld [vmem:[#allocation2 + $0x50] sm:$0xff] }
  0x56   :  { %1225 = vmatmul.mubr.bf16.gmra.mxu0 %v1318_v31  ;;  %1257 = vmatmul.mubr.bf16.gmra.mxu1 %v1319_v32 }
  0x57   :  { %1228 = vmatprep.mubr.bf16.mxu0 %v1320_v33  ;;  %1260 = vmatprep.mubr.bf16.mxu1 %v1321_v34 }
  0x5e   :  { %1229 = vmatmul.mubr.bf16.gmra.mxu0 %v1322_v35  ;;  %1261 = vmatmul.mubr.bf16.gmra.mxu1 %v1323_v36  ;;  %v140_v35 = vld [vmem:[#allocation2 + $0x150] sm:$0xff] }
  0x5f   :  { %1232 = vmatprep.mubr.bf16.mxu0 %v1324_v37  ;;  %1264 = vmatprep.mubr.bf16.mxu1 %v1325_v38 }
  0x66   :  { %1233 = vmatmul.mubr.bf16.gmra.mxu0 %v1326_v39  ;;  %1265 = vmatmul.mubr.bf16.gmra.mxu1 %v1327_v40  ;;  %v106_v40 = vld [vmem:[#allocation2 + $0x40] sm:$0xff] }
  0xee   :  { %v1206_v43 = vpop.f32.mrf.mxu0  ;;  %v1238_v44 = vpop.f32.mrf.mxu1 }
  0xef   :  { %v773_v47 = vadd.f32 %v1206_v43, %v100_v41  ;;  %v805_v48 = vadd.f32 %v1238_v44, %v132_v42 }
  0xf0   :  { %v516_v49 = vpop.f32.mrf.mxu0  ;;  %v644_v50 = vpop.f32.mrf.mxu1 }
  0xf1   :  { %838 = vst.msk [vmem:[#allocation2 + $0x10] sm:$0xff] %vm33_vm0, %v773_v47  ;;  %870 = vst.msk [vmem:[#allocation2 + $0x110] sm:$0xff] %vm33_vm0, %v805_v48  ;;  %v771_v53 = vadd.f32 %v516_v49, %v98_v45  ;;  %v803_v54 = vadd.f32 %v644_v50, %v130_v46  ;;  %v138_v45 = vld [vmem:[#allocation2 + $0x140] sm:$0xff]  ;;  %v109_v50 = vld [vmem:[#allocation2 + $0x58] sm:$0xff] }
  0xf2   :  { %v1207_v55 = vpop.f32.mrf.mxu0  ;;  %v1239_v56 = vpop.f32.mrf.mxu1 }
  0xf3   :  { %836 = vst.msk [vmem:[#allocation2] sm:$0xff] %vm33_vm0, %v771_v53  ;;  %868 = vst.msk [vmem:[#allocation2 + $0x100] sm:$0xff] %vm33_vm0, %v803_v54  ;;  %v774_v59 = vadd.f32 %v1207_v55, %v101_v51  ;;  %v806_v60 = vadd.f32 %v1239_v56, %v133_v52  ;;  %v141_v55 = vld [vmem:[#allocation2 + $0x158] sm:$0xff] }
  0xf4   :  { %v519_v61 = vpop.f32.mrf.mxu0  ;;  %v647_v62 = vpop.f32.mrf.mxu1 }
  0xf5   :  { %839 = vst.msk [vmem:[#allocation2 + $0x18] sm:$0xff] %vm33_vm0, %v774_v59  ;;  %871 = vst.msk [vmem:[#allocation2 + $0x118] sm:$0xff] %vm33_vm0, %v806_v60  ;;  %v772_v1 = vadd.f32 %v519_v61, %v99_v57  ;;  %v804_v2 = vadd.f32 %v647_v62, %v131_v58  ;;  %v107_v60 = vld [vmem:[#allocation2 + $0x48] sm:$0xff] }
  0xf6   :  { %v1210_v4 = vpop.f32.mrf.mxu0  ;;  %v1242_v5 = vpop.f32.mrf.mxu1 }
  0xf7   :  { %837 = vst.msk [vmem:[#allocation2 + $0x8] sm:$0xff] %vm33_vm0, %v772_v1  ;;  %869 = vst.msk [vmem:[#allocation2 + $0x108] sm:$0xff] %vm33_vm0, %v804_v2  ;;  %v777_v8 = vadd.f32 %v1210_v4, %v104_v63  ;;  %v809_v9 = vadd.f32 %v1242_v5, %v136_v0  ;;  %v139_v1 = vld [vmem:[#allocation2 + $0x148] sm:$0xff] }
  0xf8   :  { %v905_v11 = vld [vmem:[#allocation2 + $0x10] sm:$0xff]  ;;  %v532_v13 = vpop.f32.mrf.mxu0  ;;  %v660_v14 = vpop.f32.mrf.mxu1 }
  0xf9   :  { %v937_v12 = vld [vmem:[#allocation2 + $0x110] sm:$0xff]  ;;  %v976_v16 = vadd.f32 %v1538_v3, %v905_v11  ;;  %842 = vst.msk [vmem:[#allocation2 + $0x30] sm:$0xff] %vm33_vm0, %v777_v8  ;;  %874 = vst.msk [vmem:[#allocation2 + $0x130] sm:$0xff] %vm33_vm0, %v809_v9  ;;  %v775_v18 = vadd.f32 %v532_v13, %v102_v6  ;;  %v807_v19 = vadd.f32 %v660_v14, %v134_v7 }
  0xfa   :  { %v1008_v17 = vadd.f32 %v1538_v3, %v937_v12  ;;  %v903_v21 = vld [vmem:[#allocation2] sm:$0xff]  ;;  %v1211_v23 = vpop.f32.mrf.mxu0  ;;  %v1243_v24 = vpop.f32.mrf.mxu1  ;;  %v112_v7 = vld [vmem:[#allocation2 + $0x70] sm:$0xff] }
  0xfb   :  { %v935_v22 = vld [vmem:[#allocation2 + $0x100] sm:$0xff]  ;;  %1040 = vst.msk [vmem:[%s1921_s3 + $0x10] sm:$0xff] %vm33_vm0, %v976_v16  ;;  %v974_v26 = vadd.f32 %v1538_v3, %v903_v21  ;;  %840 = vst.msk [vmem:[#allocation2 + $0x20] sm:$0xff] %vm33_vm0, %v775_v18  ;;  %v778_v28 = vadd.f32 %v1211_v23, %v105_v10  ;;  %v810_v29 = vadd.f32 %v1243_v24, %v137_v15  ;;  %v144_v12 = vld [vmem:[#allocation2 + $0x170] sm:$0xff] }
  0xfc   :  { %1072 = vst.msk [vmem:[%s1921_s3 + $0x110] sm:$0xff] %vm33_vm0, %v1008_v17  ;;  %v1006_v27 = vadd.f32 %v1538_v3, %v935_v22  ;;  %872 = vst.msk [vmem:[#allocation2 + $0x120] sm:$0xff] %vm33_vm0, %v807_v19  ;;  %v906_v31 = vld [vmem:[#allocation2 + $0x18] sm:$0xff]  ;;  %v535_v33 = vpop.f32.mrf.mxu0  ;;  %v663_v34 = vpop.f32.mrf.mxu1  ;;  %v110_v17 = vld [vmem:[#allocation2 + $0x60] sm:$0xff] }
  0xfd   :  { %v938_v32 = vld [vmem:[#allocation2 + $0x118] sm:$0xff]  ;;  %1038 = vst.msk [vmem:[%s1921_s3] sm:$0xff] %vm33_vm0, %v974_v26  ;;  %v977_v36 = vadd.f32 %v1538_v3, %v906_v31  ;;  %843 = vst.msk [vmem:[#allocation2 + $0x38] sm:$0xff] %vm33_vm0, %v778_v28  ;;  %v776_v38 = vadd.f32 %v535_v33, %v103_v20  ;;  %v808_v39 = vadd.f32 %v663_v34, %v135_v25  ;;  %v142_v22 = vld [vmem:[#allocation2 + $0x160] sm:$0xff] }
  0xfe   :  { %1070 = vst.msk [vmem:[%s1921_s3 + $0x100] sm:$0xff] %vm33_vm0, %v1006_v27  ;;  %v1009_v37 = vadd.f32 %v1538_v3, %v938_v32  ;;  %875 = vst.msk [vmem:[#allocation2 + $0x138] sm:$0xff] %vm33_vm0, %v810_v29  ;;  %v904_v41 = vld [vmem:[#allocation2 + $0x8] sm:$0xff]  ;;  %v1214_v43 = vpop.f32.mrf.mxu0  ;;  %v1246_v44 = vpop.f32.mrf.mxu1  ;;  %v113_v27 = vld [vmem:[#allocation2 + $0x78] sm:$0xff] }
  0xff   :  { %v936_v42 = vld [vmem:[#allocation2 + $0x108] sm:$0xff]  ;;  %1041 = vst.msk [vmem:[%s1921_s3 + $0x18] sm:$0xff] %vm33_vm0, %v977_v36  ;;  %v975_v46 = vadd.f32 %v1538_v3, %v904_v41  ;;  %841 = vst.msk [vmem:[#allocation2 + $0x28] sm:$0xff] %vm33_vm0, %v776_v38  ;;  %v781_v48 = vadd.f32 %v1214_v43, %v108_v30  ;;  %v813_v49 = vadd.f32 %v1246_v44, %v140_v35  ;;  %v145_v32 = vld [vmem:[#allocation2 + $0x178] sm:$0xff] }
 0x100   :  { %1073 = vst.msk [vmem:[%s1921_s3 + $0x118] sm:$0xff] %vm33_vm0, %v1009_v37  ;;  %v1007_v47 = vadd.f32 %v1538_v3, %v936_v42  ;;  %873 = vst.msk [vmem:[#allocation2 + $0x128] sm:$0xff] %vm33_vm0, %v808_v39  ;;  %v909_v51 = vld [vmem:[#allocation2 + $0x30] sm:$0xff]  ;;  %v548_v53 = vpop.f32.mrf.mxu0  ;;  %v676_v54 = vpop.f32.mrf.mxu1  ;;  %v111_v37 = vld [vmem:[#allocation2 + $0x68] sm:$0xff] }
 0x101   :  { %v941_v52 = vld [vmem:[#allocation2 + $0x130] sm:$0xff]  ;;  %1039 = vst.msk [vmem:[%s1921_s3 + $0x8] sm:$0xff] %vm33_vm0, %v975_v46  ;;  %v980_v56 = vadd.f32 %v1538_v3, %v909_v51  ;;  %846 = vst.msk [vmem:[#allocation2 + $0x50] sm:$0xff] %vm33_vm0, %v781_v48  ;;  %v779_v58 = vadd.f32 %v548_v53, %v106_v40  ;;  %v811_v59 = vadd.f32 %v676_v54, %v138_v45  ;;  %v143_v42 = vld [vmem:[#allocation2 + $0x168] sm:$0xff] }
 0x102   :  { %1071 = vst.msk [vmem:[%s1921_s3 + $0x108] sm:$0xff] %vm33_vm0, %v1007_v47  ;;  %v1012_v57 = vadd.f32 %v1538_v3, %v941_v52  ;;  %878 = vst.msk [vmem:[#allocation2 + $0x150] sm:$0xff] %vm33_vm0, %v813_v49  ;;  %v907_v61 = vld [vmem:[#allocation2 + $0x20] sm:$0xff]  ;;  %v1215_v63 = vpop.f32.mrf.mxu0  ;;  %v1247_v0 = vpop.f32.mrf.mxu1  ;;  %v116_v47 = vld [vmem:[#allocation2 + $0x90] sm:$0xff] }
 0x103   :  { %v939_v62 = vld [vmem:[#allocation2 + $0x120] sm:$0xff]  ;;  %1044 = vst.msk [vmem:[%s1921_s3 + $0x30] sm:$0xff] %vm33_vm0, %v980_v56  ;;  %v978_v2 = vadd.f32 %v1538_v3, %v907_v61  ;;  %844 = vst.msk [vmem:[#allocation2 + $0x40] sm:$0xff] %vm33_vm0, %v779_v58  ;;  %v782_v5 = vadd.f32 %v1215_v63, %v109_v50  ;;  %v814_v6 = vadd.f32 %v1247_v0, %v141_v55  ;;  %v148_v52 = vld [vmem:[#allocation2 + $0x190] sm:$0xff] }
 0x104   :  { %1076 = vst.msk [vmem:[%s1921_s3 + $0x130] sm:$0xff] %vm33_vm0, %v1012_v57  ;;  %v1010_v4 = vadd.f32 %v1538_v3, %v939_v62  ;;  %876 = vst.msk [vmem:[#allocation2 + $0x140] sm:$0xff] %vm33_vm0, %v811_v59  ;;  %v910_v8 = vld [vmem:[#allocation2 + $0x38] sm:$0xff]  ;;  %v551_v10 = vpop.f32.mrf.mxu0  ;;  %v679_v11 = vpop.f32.mrf.mxu1  ;;  %v114_v57 = vld [vmem:[#allocation2 + $0x80] sm:$0xff] }
 0x105   :  { %v942_v9 = vld [vmem:[#allocation2 + $0x138] sm:$0xff]  ;;  %1042 = vst.msk [vmem:[%s1921_s3 + $0x20] sm:$0xff] %vm33_vm0, %v978_v2  ;;  %v981_v13 = vadd.f32 %v1538_v3, %v910_v8  ;;  %847 = vst.msk [vmem:[#allocation2 + $0x58] sm:$0xff] %vm33_vm0, %v782_v5  ;;  %v780_v15 = vadd.f32 %v551_v10, %v107_v60  ;;  %v812_v16 = vadd.f32 %v679_v11, %v139_v1  ;;  %v146_v62 = vld [vmem:[#allocation2 + $0x180] sm:$0xff] }
 0x106   :  { %1074 = vst.msk [vmem:[%s1921_s3 + $0x120] sm:$0xff] %vm33_vm0, %v1010_v4  ;;  %v1013_v14 = vadd.f32 %v1538_v3, %v942_v9  ;;  %879 = vst.msk [vmem:[#allocation2 + $0x158] sm:$0xff] %vm33_vm0, %v814_v6  ;;  %v908_v18 = vld [vmem:[#allocation2 + $0x28] sm:$0xff]  ;;  %v1218_v20 = vpop.f32.mrf.mxu0  ;;  %v1250_v21 = vpop.f32.mrf.mxu1  ;;  %v117_v4 = vld [vmem:[#allocation2 + $0x98] sm:$0xff] }
 0x107   :  { %v940_v19 = vld [vmem:[#allocation2 + $0x128] sm:$0xff]  ;;  %1045 = vst.msk [vmem:[%s1921_s3 + $0x38] sm:$0xff] %vm33_vm0, %v981_v13  ;;  %v979_v23 = vadd.f32 %v1538_v3, %v908_v18  ;;  %845 = vst.msk [vmem:[#allocation2 + $0x48] sm:$0xff] %vm33_vm0, %v780_v15  ;;  %v785_v25 = vadd.f32 %v1218_v20, %v112_v7  ;;  %v817_v26 = vadd.f32 %v1250_v21, %v144_v12  ;;  %v149_v9 = vld [vmem:[#allocation2 + $0x198] sm:$0xff] }
 0x108   :  { %1077 = vst.msk [vmem:[%s1921_s3 + $0x138] sm:$0xff] %vm33_vm0, %v1013_v14  ;;  %v1011_v24 = vadd.f32 %v1538_v3, %v940_v19  ;;  %877 = vst.msk [vmem:[#allocation2 + $0x148] sm:$0xff] %vm33_vm0, %v812_v16  ;;  %v913_v28 = vld [vmem:[#allocation2 + $0x50] sm:$0xff]  ;;  %v564_v30 = vpop.f32.mrf.mxu0  ;;  %v692_v31 = vpop.f32.mrf.mxu1  ;;  %v115_v14 = vld [vmem:[#allocation2 + $0x88] sm:$0xff] }
 0x109   :  { %v945_v29 = vld [vmem:[#allocation2 + $0x150] sm:$0xff]  ;;  %1043 = vst.msk [vmem:[%s1921_s3 + $0x28] sm:$0xff] %vm33_vm0, %v979_v23  ;;  %v984_v33 = vadd.f32 %v1538_v3, %v913_v28  ;;  %850 = vst.msk [vmem:[#allocation2 + $0x70] sm:$0xff] %vm33_vm0, %v785_v25  ;;  %v783_v35 = vadd.f32 %v564_v30, %v110_v17  ;;  %v815_v36 = vadd.f32 %v692_v31, %v142_v22  ;;  %v147_v19 = vld [vmem:[#allocation2 + $0x188] sm:$0xff] }
 0x10a   :  { %1075 = vst.msk [vmem:[%s1921_s3 + $0x128] sm:$0xff] %vm33_vm0, %v1011_v24  ;;  %v1016_v34 = vadd.f32 %v1538_v3, %v945_v29  ;;  %882 = vst.msk [vmem:[#allocation2 + $0x170] sm:$0xff] %vm33_vm0, %v817_v26  ;;  %v911_v38 = vld [vmem:[#allocation2 + $0x40] sm:$0xff]  ;;  %v1219_v40 = vpop.f32.mrf.mxu0  ;;  %v1251_v41 = vpop.f32.mrf.mxu1  ;;  %v120_v24 = vld [vmem:[#allocation2 + $0xb0] sm:$0xff] }
 0x10b   :  { %v943_v39 = vld [vmem:[#allocation2 + $0x140] sm:$0xff]  ;;  %1048 = vst.msk [vmem:[%s1921_s3 + $0x50] sm:$0xff] %vm33_vm0, %v984_v33  ;;  %v982_v43 = vadd.f32 %v1538_v3, %v911_v38  ;;  %848 = vst.msk [vmem:[#allocation2 + $0x60] sm:$0xff] %vm33_vm0, %v783_v35  ;;  %v786_v45 = vadd.f32 %v1219_v40, %v113_v27  ;;  %v818_v46 = vadd.f32 %v1251_v41, %v145_v32  ;;  %v152_v29 = vld [vmem:[#allocation2 + $0x1b0] sm:$0xff] }
 0x10c   :  { %1080 = vst.msk [vmem:[%s1921_s3 + $0x150] sm:$0xff] %vm33_vm0, %v1016_v34  ;;  %v1014_v44 = vadd.f32 %v1538_v3, %v943_v39  ;;  %880 = vst.msk [vmem:[#allocation2 + $0x160] sm:$0xff] %vm33_vm0, %v815_v36  ;;  %v914_v48 = vld [vmem:[#allocation2 + $0x58] sm:$0xff]  ;;  %v567_v50 = vpop.f32.mrf.mxu0  ;;  %v695_v51 = vpop.f32.mrf.mxu1  ;;  %v118_v34 = vld [vmem:[#allocation2 + $0xa0] sm:$0xff] }
 0x10d   :  { %v946_v49 = vld [vmem:[#allocation2 + $0x158] sm:$0xff]  ;;  %1046 = vst.msk [vmem:[%s1921_s3 + $0x40] sm:$0xff] %vm33_vm0, %v982_v43  ;;  %v985_v53 = vadd.f32 %v1538_v3, %v914_v48  ;;  %851 = vst.msk [vmem:[#allocation2 + $0x78] sm:$0xff] %vm33_vm0, %v786_v45  ;;  %v784_v55 = vadd.f32 %v567_v50, %v111_v37  ;;  %v816_v56 = vadd.f32 %v695_v51, %v143_v42  ;;  %v150_v39 = vld [vmem:[#allocation2 + $0x1a0] sm:$0xff] }
 0x10e   :  { %1078 = vst.msk [vmem:[%s1921_s3 + $0x140] sm:$0xff] %vm33_vm0, %v1014_v44  ;;  %v1017_v54 = vadd.f32 %v1538_v3, %v946_v49  ;;  %883 = vst.msk [vmem:[#allocation2 + $0x178] sm:$0xff] %vm33_vm0, %v818_v46  ;;  %v912_v58 = vld [vmem:[#allocation2 + $0x48] sm:$0xff]  ;;  %v1222_v60 = vpop.f32.mrf.mxu0  ;;  %v1254_v61 = vpop.f32.mrf.mxu1  ;;  %v121_v44 = vld [vmem:[#allocation2 + $0xb8] sm:$0xff] }
 0x10f   :  { %v944_v59 = vld [vmem:[#allocation2 + $0x148] sm:$0xff]  ;;  %1049 = vst.msk [vmem:[%s1921_s3 + $0x58] sm:$0xff] %vm33_vm0, %v985_v53  ;;  %v983_v63 = vadd.f32 %v1538_v3, %v912_v58  ;;  %849 = vst.msk [vmem:[#allocation2 + $0x68] sm:$0xff] %vm33_vm0, %v784_v55  ;;  %v789_v1 = vadd.f32 %v1222_v60, %v116_v47  ;;  %v821_v2 = vadd.f32 %v1254_v61, %v148_v52  ;;  %v153_v49 = vld [vmem:[#allocation2 + $0x1b8] sm:$0xff] }
 0x110   :  { %1081 = vst.msk [vmem:[%s1921_s3 + $0x158] sm:$0xff] %vm33_vm0, %v1017_v54  ;;  %v1015_v0 = vadd.f32 %v1538_v3, %v944_v59  ;;  %881 = vst.msk [vmem:[#allocation2 + $0x168] sm:$0xff] %vm33_vm0, %v816_v56  ;;  %v917_v5 = vld [vmem:[#allocation2 + $0x70] sm:$0xff]  ;;  %v580_v7 = vpop.f32.mrf.mxu0  ;;  %v708_v8 = vpop.f32.mrf.mxu1  ;;  %v119_v54 = vld [vmem:[#allocation2 + $0xa8] sm:$0xff] }
 0x111   :  { %v949_v6 = vld [vmem:[#allocation2 + $0x170] sm:$0xff]  ;;  %1047 = vst.msk [vmem:[%s1921_s3 + $0x48] sm:$0xff] %vm33_vm0, %v983_v63  ;;  %v988_v10 = vadd.f32 %v1538_v3, %v917_v5  ;;  %854 = vst.msk [vmem:[#allocation2 + $0x90] sm:$0xff] %vm33_vm0, %v789_v1  ;;  %v787_v12 = vadd.f32 %v580_v7, %v114_v57  ;;  %v819_v13 = vadd.f32 %v708_v8, %v146_v62  ;;  %v151_v59 = vld [vmem:[#allocation2 + $0x1a8] sm:$0xff] }
 0x112   :  { %1079 = vst.msk [vmem:[%s1921_s3 + $0x148] sm:$0xff] %vm33_vm0, %v1015_v0  ;;  %v1020_v11 = vadd.f32 %v1538_v3, %v949_v6  ;;  %886 = vst.msk [vmem:[#allocation2 + $0x190] sm:$0xff] %vm33_vm0, %v821_v2  ;;  %v915_v15 = vld [vmem:[#allocation2 + $0x60] sm:$0xff]  ;;  %v1223_v17 = vpop.f32.mrf.mxu0  ;;  %v1255_v18 = vpop.f32.mrf.mxu1  ;;  %v124_v0 = vld [vmem:[#allocation2 + $0xd0] sm:$0xff] }
 0x113   :  { %v947_v16 = vld [vmem:[#allocation2 + $0x160] sm:$0xff]  ;;  %1052 = vst.msk [vmem:[%s1921_s3 + $0x70] sm:$0xff] %vm33_vm0, %v988_v10  ;;  %v986_v20 = vadd.f32 %v1538_v3, %v915_v15  ;;  %852 = vst.msk [vmem:[#allocation2 + $0x80] sm:$0xff] %vm33_vm0, %v787_v12  ;;  %v790_v22 = vadd.f32 %v1223_v17, %v117_v4  ;;  %v822_v23 = vadd.f32 %v1255_v18, %v149_v9  ;;  %v156_v6 = vld [vmem:[#allocation2 + $0x1d0] sm:$0xff] }
 0x114   :  { %1084 = vst.msk [vmem:[%s1921_s3 + $0x170] sm:$0xff] %vm33_vm0, %v1020_v11  ;;  %v1018_v21 = vadd.f32 %v1538_v3, %v947_v16  ;;  %884 = vst.msk [vmem:[#allocation2 + $0x180] sm:$0xff] %vm33_vm0, %v819_v13  ;;  %v918_v25 = vld [vmem:[#allocation2 + $0x78] sm:$0xff]  ;;  %v583_v27 = vpop.f32.mrf.mxu0  ;;  %v711_v28 = vpop.f32.mrf.mxu1  ;;  %v122_v11 = vld [vmem:[#allocation2 + $0xc0] sm:$0xff] }
 0x115   :  { %v950_v26 = vld [vmem:[#allocation2 + $0x178] sm:$0xff]  ;;  %1050 = vst.msk [vmem:[%s1921_s3 + $0x60] sm:$0xff] %vm33_vm0, %v986_v20  ;;  %v989_v30 = vadd.f32 %v1538_v3, %v918_v25  ;;  %855 = vst.msk [vmem:[#allocation2 + $0x98] sm:$0xff] %vm33_vm0, %v790_v22  ;;  %v788_v32 = vadd.f32 %v583_v27, %v115_v14  ;;  %v820_v33 = vadd.f32 %v711_v28, %v147_v19  ;;  %v154_v16 = vld [vmem:[#allocation2 + $0x1c0] sm:$0xff] }
 0x116   :  { %1082 = vst.msk [vmem:[%s1921_s3 + $0x160] sm:$0xff] %vm33_vm0, %v1018_v21  ;;  %v1021_v31 = vadd.f32 %v1538_v3, %v950_v26  ;;  %887 = vst.msk [vmem:[#allocation2 + $0x198] sm:$0xff] %vm33_vm0, %v822_v23  ;;  %v916_v35 = vld [vmem:[#allocation2 + $0x68] sm:$0xff]  ;;  %v1226_v37 = vpop.f32.mrf.mxu0  ;;  %v1258_v38 = vpop.f32.mrf.mxu1  ;;  %v125_v21 = vld [vmem:[#allocation2 + $0xd8] sm:$0xff] }
 0x117   :  { %v948_v36 = vld [vmem:[#allocation2 + $0x168] sm:$0xff]  ;;  %1053 = vst.msk [vmem:[%s1921_s3 + $0x78] sm:$0xff] %vm33_vm0, %v989_v30  ;;  %v987_v40 = vadd.f32 %v1538_v3, %v916_v35  ;;  %853 = vst.msk [vmem:[#allocation2 + $0x88] sm:$0xff] %vm33_vm0, %v788_v32  ;;  %v793_v42 = vadd.f32 %v1226_v37, %v120_v24  ;;  %v825_v43 = vadd.f32 %v1258_v38, %v152_v29  ;;  %v157_v26 = vld [vmem:[#allocation2 + $0x1d8] sm:$0xff] }
 0x118   :  { %1085 = vst.msk [vmem:[%s1921_s3 + $0x178] sm:$0xff] %vm33_vm0, %v1021_v31  ;;  %v1019_v41 = vadd.f32 %v1538_v3, %v948_v36  ;;  %885 = vst.msk [vmem:[#allocation2 + $0x188] sm:$0xff] %vm33_vm0, %v820_v33  ;;  %v921_v45 = vld [vmem:[#allocation2 + $0x90] sm:$0xff]  ;;  %v596_v47 = vpop.f32.mrf.mxu0  ;;  %v724_v48 = vpop.f32.mrf.mxu1  ;;  %v123_v31 = vld [vmem:[#allocation2 + $0xc8] sm:$0xff] }
 0x119   :  { %v953_v46 = vld [vmem:[#allocation2 + $0x190] sm:$0xff]  ;;  %1051 = vst.msk [vmem:[%s1921_s3 + $0x68] sm:$0xff] %vm33_vm0, %v987_v40  ;;  %v992_v50 = vadd.f32 %v1538_v3, %v921_v45  ;;  %858 = vst.msk [vmem:[#allocation2 + $0xb0] sm:$0xff] %vm33_vm0, %v793_v42  ;;  %v791_v52 = vadd.f32 %v596_v47, %v118_v34  ;;  %v823_v53 = vadd.f32 %v724_v48, %v150_v39  ;;  %v155_v36 = vld [vmem:[#allocation2 + $0x1c8] sm:$0xff] }
 0x11a   :  { %1083 = vst.msk [vmem:[%s1921_s3 + $0x168] sm:$0xff] %vm33_vm0, %v1019_v41  ;;  %v1024_v51 = vadd.f32 %v1538_v3, %v953_v46  ;;  %890 = vst.msk [vmem:[#allocation2 + $0x1b0] sm:$0xff] %vm33_vm0, %v825_v43  ;;  %v919_v55 = vld [vmem:[#allocation2 + $0x80] sm:$0xff]  ;;  %v1227_v57 = vpop.f32.mrf.mxu0  ;;  %v1259_v58 = vpop.f32.mrf.mxu1  ;;  %v128_v41 = vld [vmem:[#allocation2 + $0xf0] sm:$0xff] }
 0x11b   :  { %v951_v56 = vld [vmem:[#allocation2 + $0x180] sm:$0xff]  ;;  %1056 = vst.msk [vmem:[%s1921_s3 + $0x90] sm:$0xff] %vm33_vm0, %v992_v50  ;;  %v990_v60 = vadd.f32 %v1538_v3, %v919_v55  ;;  %856 = vst.msk [vmem:[#allocation2 + $0xa0] sm:$0xff] %vm33_vm0, %v791_v52  ;;  %v794_v62 = vadd.f32 %v1227_v57, %v121_v44  ;;  %v826_v63 = vadd.f32 %v1259_v58, %v153_v49  ;;  %v160_v46 = vld [vmem:[#allocation2 + $0x1f0] sm:$0xff] }
 0x11c   :  { %1088 = vst.msk [vmem:[%s1921_s3 + $0x190] sm:$0xff] %vm33_vm0, %v1024_v51  ;;  %v1022_v61 = vadd.f32 %v1538_v3, %v951_v56  ;;  %888 = vst.msk [vmem:[#allocation2 + $0x1a0] sm:$0xff] %vm33_vm0, %v823_v53  ;;  %v922_v1 = vld [vmem:[#allocation2 + $0x98] sm:$0xff]  ;;  %v599_v4 = vpop.f32.mrf.mxu0  ;;  %v727_v5 = vpop.f32.mrf.mxu1  ;;  %v126_v51 = vld [vmem:[#allocation2 + $0xe0] sm:$0xff] }
 0x11d   :  { %v954_v2 = vld [vmem:[#allocation2 + $0x198] sm:$0xff]  ;;  %1054 = vst.msk [vmem:[%s1921_s3 + $0x80] sm:$0xff] %vm33_vm0, %v990_v60  ;;  %v993_v7 = vadd.f32 %v1538_v3, %v922_v1  ;;  %859 = vst.msk [vmem:[#allocation2 + $0xb8] sm:$0xff] %vm33_vm0, %v794_v62  ;;  %v792_v9 = vadd.f32 %v599_v4, %v119_v54  ;;  %v824_v10 = vadd.f32 %v727_v5, %v151_v59  ;;  %v158_v56 = vld [vmem:[#allocation2 + $0x1e0] sm:$0xff] }
 0x11e   :  { %1086 = vst.msk [vmem:[%s1921_s3 + $0x180] sm:$0xff] %vm33_vm0, %v1022_v61  ;;  %v1025_v8 = vadd.f32 %v1538_v3, %v954_v2  ;;  %891 = vst.msk [vmem:[#allocation2 + $0x1b8] sm:$0xff] %vm33_vm0, %v826_v63  ;;  %v920_v12 = vld [vmem:[#allocation2 + $0x88] sm:$0xff]  ;;  %v1230_v14 = vpop.f32.mrf.mxu0  ;;  %v1262_v15 = vpop.f32.mrf.mxu1  ;;  %v129_v61 = vld [vmem:[#allocation2 + $0xf8] sm:$0xff] }
 0x11f   :  { %v952_v13 = vld [vmem:[#allocation2 + $0x188] sm:$0xff]  ;;  %1057 = vst.msk [vmem:[%s1921_s3 + $0x98] sm:$0xff] %vm33_vm0, %v993_v7  ;;  %v991_v17 = vadd.f32 %v1538_v3, %v920_v12  ;;  %857 = vst.msk [vmem:[#allocation2 + $0xa8] sm:$0xff] %vm33_vm0, %v792_v9  ;;  %v797_v19 = vadd.f32 %v1230_v14, %v124_v0  ;;  %v829_v20 = vadd.f32 %v1262_v15, %v156_v6  ;;  %v161_v2 = vld [vmem:[#allocation2 + $0x1f8] sm:$0xff] }
 0x120   :  { %1089 = vst.msk [vmem:[%s1921_s3 + $0x198] sm:$0xff] %vm33_vm0, %v1025_v8  ;;  %v1023_v18 = vadd.f32 %v1538_v3, %v952_v13  ;;  %889 = vst.msk [vmem:[#allocation2 + $0x1a8] sm:$0xff] %vm33_vm0, %v824_v10  ;;  %v925_v22 = vld [vmem:[#allocation2 + $0xb0] sm:$0xff]  ;;  %v612_v24 = vpop.f32.mrf.mxu0  ;;  %v740_v25 = vpop.f32.mrf.mxu1  ;;  %v127_v8 = vld [vmem:[#allocation2 + $0xe8] sm:$0xff] }
 0x121   :  { %v957_v23 = vld [vmem:[#allocation2 + $0x1b0] sm:$0xff]  ;;  %1055 = vst.msk [vmem:[%s1921_s3 + $0x88] sm:$0xff] %vm33_vm0, %v991_v17  ;;  %v996_v27 = vadd.f32 %v1538_v3, %v925_v22  ;;  %862 = vst.msk [vmem:[#allocation2 + $0xd0] sm:$0xff] %vm33_vm0, %v797_v19  ;;  %v795_v29 = vadd.f32 %v612_v24, %v122_v11  ;;  %v827_v30 = vadd.f32 %v740_v25, %v154_v16  ;;  %v159_v13 = vld [vmem:[#allocation2 + $0x1e8] sm:$0xff] }
 0x122   :  { %1087 = vst.msk [vmem:[%s1921_s3 + $0x188] sm:$0xff] %vm33_vm0, %v1023_v18  ;;  %v1028_v28 = vadd.f32 %v1538_v3, %v957_v23  ;;  %894 = vst.msk [vmem:[#allocation2 + $0x1d0] sm:$0xff] %vm33_vm0, %v829_v20  ;;  %v923_v32 = vld [vmem:[#allocation2 + $0xa0] sm:$0xff]  ;;  %v1231_v34 = vpop.f32.mrf.mxu0  ;;  %v1263_v35 = vpop.f32.mrf.mxu1 }
 0x123   :  { %v955_v33 = vld [vmem:[#allocation2 + $0x1a0] sm:$0xff]  ;;  %1060 = vst.msk [vmem:[%s1921_s3 + $0xb0] sm:$0xff] %vm33_vm0, %v996_v27  ;;  %v994_v37 = vadd.f32 %v1538_v3, %v923_v32  ;;  %860 = vst.msk [vmem:[#allocation2 + $0xc0] sm:$0xff] %vm33_vm0, %v795_v29  ;;  %v798_v39 = vadd.f32 %v1231_v34, %v125_v21  ;;  %v830_v40 = vadd.f32 %v1263_v35, %v157_v26 }
 0x124   :  { %1092 = vst.msk [vmem:[%s1921_s3 + $0x1b0] sm:$0xff] %vm33_vm0, %v1028_v28  ;;  %v1026_v38 = vadd.f32 %v1538_v3, %v955_v33  ;;  %892 = vst.msk [vmem:[#allocation2 + $0x1c0] sm:$0xff] %vm33_vm0, %v827_v30  ;;  %v926_v42 = vld [vmem:[#allocation2 + $0xb8] sm:$0xff]  ;;  %v615_v44 = vpop.f32.mrf.mxu0  ;;  %v743_v45 = vpop.f32.mrf.mxu1 }
 0x125   :  { %v958_v43 = vld [vmem:[#allocation2 + $0x1b8] sm:$0xff]  ;;  %1058 = vst.msk [vmem:[%s1921_s3 + $0xa0] sm:$0xff] %vm33_vm0, %v994_v37  ;;  %v997_v47 = vadd.f32 %v1538_v3, %v926_v42  ;;  %863 = vst.msk [vmem:[#allocation2 + $0xd8] sm:$0xff] %vm33_vm0, %v798_v39  ;;  %v796_v49 = vadd.f32 %v615_v44, %v123_v31  ;;  %v828_v50 = vadd.f32 %v743_v45, %v155_v36 }
 0x126   :  { %1090 = vst.msk [vmem:[%s1921_s3 + $0x1a0] sm:$0xff] %vm33_vm0, %v1026_v38  ;;  %v1029_v48 = vadd.f32 %v1538_v3, %v958_v43  ;;  %895 = vst.msk [vmem:[#allocation2 + $0x1d8] sm:$0xff] %vm33_vm0, %v830_v40  ;;  %v924_v52 = vld [vmem:[#allocation2 + $0xa8] sm:$0xff]  ;;  %v1234_v54 = vpop.f32.mrf.mxu0  ;;  %v1266_v55 = vpop.f32.mrf.mxu1 }
 0x127   :  { %v956_v53 = vld [vmem:[#allocation2 + $0x1a8] sm:$0xff]  ;;  %1061 = vst.msk [vmem:[%s1921_s3 + $0xb8] sm:$0xff] %vm33_vm0, %v997_v47  ;;  %v995_v57 = vadd.f32 %v1538_v3, %v924_v52  ;;  %861 = vst.msk [vmem:[#allocation2 + $0xc8] sm:$0xff] %vm33_vm0, %v796_v49  ;;  %v801_v59 = vadd.f32 %v1234_v54, %v128_v41  ;;  %v833_v60 = vadd.f32 %v1266_v55, %v160_v46 }
 0x128   :  { %1093 = vst.msk [vmem:[%s1921_s3 + $0x1b8] sm:$0xff] %vm33_vm0, %v1029_v48  ;;  %v1027_v58 = vadd.f32 %v1538_v3, %v956_v53  ;;  %893 = vst.msk [vmem:[#allocation2 + $0x1c8] sm:$0xff] %vm33_vm0, %v828_v50  ;;  %v929_v62 = vld [vmem:[#allocation2 + $0xd0] sm:$0xff]  ;;  %v628_v0 = vpop.f32.mrf.mxu0  ;;  %v756_v1 = vpop.f32.mrf.mxu1 }
 0x129   :  { %v961_v63 = vld [vmem:[#allocation2 + $0x1d0] sm:$0xff]  ;;  %1059 = vst.msk [vmem:[%s1921_s3 + $0xa8] sm:$0xff] %vm33_vm0, %v995_v57  ;;  %v1000_v4 = vadd.f32 %v1538_v3, %v929_v62  ;;  %866 = vst.msk [vmem:[#allocation2 + $0xf0] sm:$0xff] %vm33_vm0, %v801_v59  ;;  %v799_v6 = vadd.f32 %v628_v0, %v126_v51  ;;  %v831_v7 = vadd.f32 %v756_v1, %v158_v56 }
 0x12a   :  { %1091 = vst.msk [vmem:[%s1921_s3 + $0x1a8] sm:$0xff] %vm33_vm0, %v1027_v58  ;;  %v1032_v5 = vadd.f32 %v1538_v3, %v961_v63  ;;  %898 = vst.msk [vmem:[#allocation2 + $0x1f0] sm:$0xff] %vm33_vm0, %v833_v60  ;;  %v927_v9 = vld [vmem:[#allocation2 + $0xc0] sm:$0xff]  ;;  %v1235_v11 = vpop.f32.mrf.mxu0  ;;  %v1267_v12 = vpop.f32.mrf.mxu1 }
 0x12b   :  { %v959_v10 = vld [vmem:[#allocation2 + $0x1c0] sm:$0xff]  ;;  %1064 = vst.msk [vmem:[%s1921_s3 + $0xd0] sm:$0xff] %vm33_vm0, %v1000_v4  ;;  %v998_v14 = vadd.f32 %v1538_v3, %v927_v9  ;;  %864 = vst.msk [vmem:[#allocation2 + $0xe0] sm:$0xff] %vm33_vm0, %v799_v6  ;;  %v802_v16 = vadd.f32 %v1235_v11, %v129_v61  ;;  %v834_v17 = vadd.f32 %v1267_v12, %v161_v2 }
 0x12c   :  { %1096 = vst.msk [vmem:[%s1921_s3 + $0x1d0] sm:$0xff] %vm33_vm0, %v1032_v5  ;;  %v1030_v15 = vadd.f32 %v1538_v3, %v959_v10  ;;  %896 = vst.msk [vmem:[#allocation2 + $0x1e0] sm:$0xff] %vm33_vm0, %v831_v7  ;;  %v930_v18 = vld [vmem:[#allocation2 + $0xd8] sm:$0xff]  ;;  %v631_v20 = vpop.f32.mrf.mxu0  ;;  %v759_v21 = vpop.f32.mrf.mxu1 }
 0x12d   :  { %v962_v19 = vld [vmem:[#allocation2 + $0x1d8] sm:$0xff]  ;;  %1062 = vst.msk [vmem:[%s1921_s3 + $0xc0] sm:$0xff] %vm33_vm0, %v998_v14  ;;  %v1001_v22 = vadd.f32 %v1538_v3, %v930_v18  ;;  %867 = vst.msk [vmem:[#allocation2 + $0xf8] sm:$0xff] %vm33_vm0, %v802_v16  ;;  %v800_v24 = vadd.f32 %v631_v20, %v127_v8  ;;  %v832_v25 = vadd.f32 %v759_v21, %v159_v13 }
 0x12e   :  { %1094 = vst.msk [vmem:[%s1921_s3 + $0x1c0] sm:$0xff] %vm33_vm0, %v1030_v15  ;;  %v1033_v23 = vadd.f32 %v1538_v3, %v962_v19  ;;  %899 = vst.msk [vmem:[#allocation2 + $0x1f8] sm:$0xff] %vm33_vm0, %v834_v17  ;;  %v928_v26 = vld [vmem:[#allocation2 + $0xc8] sm:$0xff] }
 0x12f   :  { %v960_v27 = vld [vmem:[#allocation2 + $0x1c8] sm:$0xff]  ;;  %1065 = vst.msk [vmem:[%s1921_s3 + $0xd8] sm:$0xff] %vm33_vm0, %v1001_v22  ;;  %v999_v28 = vadd.f32 %v1538_v3, %v928_v26  ;;  %865 = vst.msk [vmem:[#allocation2 + $0xe8] sm:$0xff] %vm33_vm0, %v800_v24 }
 0x130   :  { %1097 = vst.msk [vmem:[%s1921_s3 + $0x1d8] sm:$0xff] %vm33_vm0, %v1033_v23  ;;  %v1031_v29 = vadd.f32 %v1538_v3, %v960_v27  ;;  %897 = vst.msk [vmem:[#allocation2 + $0x1e8] sm:$0xff] %vm33_vm0, %v832_v25  ;;  %v933_v30 = vld [vmem:[#allocation2 + $0xf0] sm:$0xff] }
 0x131   :  { %v965_v31 = vld [vmem:[#allocation2 + $0x1f0] sm:$0xff]  ;;  %1063 = vst.msk [vmem:[%s1921_s3 + $0xc8] sm:$0xff] %vm33_vm0, %v999_v28  ;;  %v1004_v32 = vadd.f32 %v1538_v3, %v933_v30 }
 0x132   :  { %1095 = vst.msk [vmem:[%s1921_s3 + $0x1c8] sm:$0xff] %vm33_vm0, %v1031_v29  ;;  %v1036_v33 = vadd.f32 %v1538_v3, %v965_v31  ;;  %v931_v34 = vld [vmem:[#allocation2 + $0xe0] sm:$0xff] }
 0x133   :  { %v963_v35 = vld [vmem:[#allocation2 + $0x1e0] sm:$0xff]  ;;  %1068 = vst.msk [vmem:[%s1921_s3 + $0xf0] sm:$0xff] %vm33_vm0, %v1004_v32  ;;  %v1002_v36 = vadd.f32 %v1538_v3, %v931_v34 }
 0x134   :  { %1100 = vst.msk [vmem:[%s1921_s3 + $0x1f0] sm:$0xff] %vm33_vm0, %v1036_v33  ;;  %v1034_v37 = vadd.f32 %v1538_v3, %v963_v35  ;;  %v934_v38 = vld [vmem:[#allocation2 + $0xf8] sm:$0xff] }
 0x135   :  { %v966_v39 = vld [vmem:[#allocation2 + $0x1f8] sm:$0xff]  ;;  %1066 = vst.msk [vmem:[%s1921_s3 + $0xe0] sm:$0xff] %vm33_vm0, %v1002_v36  ;;  %v1005_v40 = vadd.f32 %v1538_v3, %v934_v38 }
 0x136   :  { %1098 = vst.msk [vmem:[%s1921_s3 + $0x1e0] sm:$0xff] %vm33_vm0, %v1034_v37  ;;  %v1037_v41 = vadd.f32 %v1538_v3, %v966_v39  ;;  %v932_v42 = vld [vmem:[#allocation2 + $0xe8] sm:$0xff] }
 0x137   :  { %v964_v43 = vld [vmem:[#allocation2 + $0x1e8] sm:$0xff]  ;;  %1069 = vst.msk [vmem:[%s1921_s3 + $0xf8] sm:$0xff] %vm33_vm0, %v1005_v40  ;;  %v1003_v44 = vadd.f32 %v1538_v3, %v932_v42 }
 0x138   :  { %1101 = vst.msk [vmem:[%s1921_s3 + $0x1f8] sm:$0xff] %vm33_vm0, %v1037_v41  ;;  %v1035_v45 = vadd.f32 %v1538_v3, %v964_v43 }
 0x139   :  { %1067 = vst.msk [vmem:[%s1921_s3 + $0xe8] sm:$0xff] %vm33_vm0, %v1003_v44 }
 0x13a   :  { %1099 = vst.msk [vmem:[%s1921_s3 + $0x1e8] sm:$0xff] %vm33_vm0, %v1035_v45 }
 0x13b   :  { %1106 = vsyncpa [#allocation4], 1 }

</bundles_post_ra>
